<compile_context>
chip_gen: v7x
topology: tpu7x:2x2x1
jax: 0.10.0
libtpu: 0.0.40
codegen_flags: <defaults>
</compile_context>

<pallas_src>
import functools

import jax
import jax.numpy as jnp
from jax import lax
from jax.experimental import pallas as pl
from jax.experimental.pallas import tpu as pltpu

LANE = 128  # TPU lane width


def _round_up(x, m):
    return (x + m - 1) // m * m


# ---------------------------------------------------------------------------
# Kernel factory: shared bias-free affine body + (stats pass, apply pass).
#   kd  = k * D_out   packed output lane width
#   knn = k * N * N   packed flattened-outer-product lane width
#   c0  = 128-aligned start of the first x_sum selector segment in w_cat
#   c1  = 128-aligned width of each selector segment
# ---------------------------------------------------------------------------
def _make_kernels(kd, knn, c0, c1):

    def _y_nobias(x_ref, wcat_ref, wpf_ref):
        # One MXU pass over the packed x tile:
        #   [x @ (I_k (x) Wz_fold) | x @ SelR_big | x @ SelT_big]
        t = jnp.dot(x_ref[...], wcat_ref[...], preferred_element_type=jnp.float32)
        y = t[:, :kd]                       # folded W_z . W_affine path (packed)
        a = t[:, c0:c0 + knn]               # x_sum[r, m] at lane seg*NN + m*N + n
        c = t[:, c0 + c1:c0 + c1 + knn]     # x_sum[r, n] at lane seg*NN + m*N + n
        outer = a * c                       # flattened outer products (f32, VPU)
        return y + jnp.dot(outer, wpf_ref[...], preferred_element_type=jnp.float32)

    # Pass 1: partial BatchNorm statistics only (no output row written).
    # Zero-padded batch rows produce y == 0 (bias-free), so no masking needed.
    def stats_kernel(x_ref, wcat_ref, wpf_ref, stats_ref):
        y = _y_nobias(x_ref, wcat_ref, wpf_ref)
        s1 = jnp.sum(y, axis=0, keepdims=True)          # [1, kd]
        s2 = jnp.sum(y * y, axis=0, keepdims=True)      # [1, kd]
        stats_ref[0] = jnp.concatenate([s1, s2], axis=0)  # [2, kd]

    # Pass 2: recompute the cheap affine math and apply full-batch BN in one
    # shot; the final (lane-dense, packed) output is the only big HBM write.
    def apply_kernel(x_ref, wcat_ref, wpf_ref, scale_ref, shift_ref, o_ref):
        y = _y_nobias(x_ref, wcat_ref, wpf_ref)
        o_ref[...] = y * scale_ref[...] + shift_ref[...]

    return stats_kernel, apply_kernel


@functools.partial(jax.jit,
                   static_argnames=("num_fields", "embedding_dim", "tile_b", "mxu_dtype"))
def outer_product_forward(x, W_z, W_p, W_affine, b_affine, gamma, beta,
                          num_fields, embedding_dim, tile_b=8192,
                          mxu_dtype=jnp.float32):
    """OuterProduct forward: fold + pack weights, run two gridded Pallas kernels."""
    del b_affine  # The linear bias is exactly cancelled by training-mode BatchNorm.

    B = x.shape[0]
    N, E = num_fields, embedding_dim
    NE, NN = N * E, N * N
    P = N * (N - 1) // 2
    D_out = W_affine.shape[0]

    # ---- row-packing factor: k consecutive batch rows -> one 128-lane row ----
    k = LANE // D_out if (0 < D_out <= LANE and LANE % D_out == 0) else 1
    # keep the resident block-diagonal weights comfortably inside VMEM
    while k > 1 and (k * NE) * (_round_up(k * D_out, LANE)
                                + 2 * _round_up(k * NN, LANE)) * 4 > (6 << 20):
        k //= 2
    kd, knn, kne = k * D_out, k * NN, k * NE
    c0 = _round_up(kd, LANE)    # 128-aligned slice boundaries inside w_cat
    c1 = _round_up(knn, LANE)

    hp = lax.Precision.HIGHEST  # one-time weight folding at full precision

    # ---- fold the output Linear through W_z / W_p (amortized, XLA side) ----
    wz_flat = jnp.transpose(W_z.reshape(N, NE), (1, 0)).astype(jnp.float32)     # [NE, N]
    wa_t = jnp.transpose(W_affine, (1, 0)).astype(jnp.float32)                  # [N+P, D_out]
    waz, wap = wa_t[:N, :], wa_t[N:, :]
    wz_fold = jnp.matmul(wz_flat, waz, precision=hp)                            # [NE, D_out]
    wp_flat = jnp.transpose(W_p.reshape(P, NN), (1, 0)).astype(jnp.float32)     # [NN, P]
    wp_fold = jnp.matmul(wp_flat, wap, precision=hp)                            # [NN, D_out]

    # Per-row selectors: x @ sel_r -> x_sum[m] at col m*N+n, x @ sel_t -> x_sum[n].
    sel = jnp.repeat(jnp.eye(N, dtype=jnp.float32), E, axis=0)                  # [NE, N]
    sel_r = jnp.repeat(sel, N, axis=1)                                          # [NE, NN]
    sel_t = jnp.tile(sel, (1, N))                                               # [NE, NN]

    # Block-diagonal expansion so k packed rows are processed by the same matmul.
    eye_k = jnp.eye(k, dtype=jnp.float32)
    wz_big = jnp.kron(eye_k, wz_fold)                                           # [kNE, kd]
    selr_big = jnp.kron(eye_k, sel_r)                                           # [kNE, knn]
    selt_big = jnp.kron(eye_k, sel_t)                                           # [kNE, knn]
    wp_big = jnp.kron(eye_k, wp_fold)                                           # [knn, kd]  (stays f32)

    w_cat = jnp.concatenate(
        [jnp.pad(wz_big, ((0, 0), (0, c0 - kd))),
         jnp.pad(selr_big, ((0, 0), (0, c1 - knn))),
         jnp.pad(selt_big, ((0, 0), (0, c1 - knn)))],
        axis=1).astype(mxu_dtype)                                               # [kNE, c0+2*c1]

    # ---- batch tiling (packed rows; batch axis stays "parallel") ----
    x = x.astype(mxu_dtype)     # bf16 here halves the dominant HBM read (v5e/v6e/v7x)
    rows_total = -(-B // k)
    tile_rows = max(8, _round_up(min(max(tile_b // k, 1), rows_total), 8))
    bp_rows = _round_up(rows_total, tile_rows)
    n_tiles = bp_rows // tile_rows
    Bp = bp_rows * k
    if Bp != B:
        x = jnp.pad(x, ((0, Bp - B), (0, 0)))   # zero rows -> zero stats contribution
    x_packed = x.reshape(bp_rows, kne)          # no-copy row-major reshape

    cparams = pltpu.CompilerParams(
        dimension_semantics=("parallel",),      # independent batch tiles -> megacore on v7x
        vmem_limit_bytes=32 * 1024 * 1024,      # safe on v7x's 64 MiB physical VMEM
    )

    stats_kernel, apply_kernel = _make_kernels(kd, knn, c0, c1)

    # ---- pass 1: partial BN statistics only (no y round trip to HBM) ----
    stats = pl.pallas_call(
        stats_kernel,
        grid=(n_tiles,),
        in_specs=[
            pl.BlockSpec((tile_rows, kne), lambda i: (i, 0)),   # packed x tile
            pl.BlockSpec(w_cat.shape, lambda i: (0, 0)),        # resident weights
            pl.BlockSpec(wp_big.shape, lambda i: (0, 0)),
        ],
        out_specs=pl.BlockSpec((1, 2, kd), lambda i: (i, 0, 0)),
        out_shape=jax.ShapeDtypeStruct((n_tiles, 2, kd), jnp.float32),
        compiler_params=cparams,
    )(x_packed, w_cat, wp_big)

    # ---- tiny XLA reduction: full-batch statistics -> BN scale/shift ----
    totals = jnp.sum(stats, axis=0).reshape(2, k, D_out).sum(axis=1)   # [2, D_out]
    mean_nb = totals[0] / B                                            # bias-free mean
    var = jnp.maximum(totals[1] / B - mean_nb * mean_nb, 0.0)          # training-mode var
    inv = lax.rsqrt(var + 1e-5)
    scale = gamma.astype(jnp.float32) * inv
    shift = beta.astype(jnp.float32) - mean_nb * scale                 # linear bias cancels in BN
    scale_kd = jnp.tile(scale, k).reshape(1, kd)
    shift_kd = jnp.tile(shift, k).reshape(1, kd)

    # ---- pass 2: recompute affine + apply BN, single lane-dense output write ----
    out_packed = pl.pallas_call(
        apply_kernel,
        grid=(n_tiles,),
        in_specs=[
            pl.BlockSpec((tile_rows, kne), lambda i: (i, 0)),
            pl.BlockSpec(w_cat.shape, lambda i: (0, 0)),
            pl.BlockSpec(wp_big.shape, lambda i: (0, 0)),
            pl.BlockSpec((1, kd), lambda i: (0, 0)),
            pl.BlockSpec((1, kd), lambda i: (0, 0)),
        ],
        out_specs=pl.BlockSpec((tile_rows, kd), lambda i: (i, 0)),
        out_shape=jax.ShapeDtypeStruct((bp_rows, kd), jnp.float32),
        compiler_params=cparams,
    )(x_packed, w_cat, wp_big, scale_kd, shift_kd)

    # Dropout(rate=0) is identity. Unpack rows and slice away batch padding.
    # TODO(synk): when D_out does not divide 128, the fallback (k=1) writes
    # D_out-wide (masked) stores; still byte-minimal, just not lane-dense.
    return out_packed.reshape(Bp, D_out)[:B]


def reference_forward(x, W_z, W_p, W_affine, b_affine, gamma, beta,
                      num_fields, embedding_dim):
    """Pure-JAX reference mirroring the PyTorch forward (training-mode BN)."""
    B = x.shape[0]
    xr = x.reshape(B, num_fields, embedding_dim)
    lz = jnp.einsum('bnm,dnm->bd', xr, W_z)
    x_sum = jnp.sum(xr, axis=-1)
    p = x_sum[:, :, None] * x_sum[:, None, :]
    lp = jnp.einsum('bmn,dmn->bd', p, W_p)
    out = jnp.concatenate([lz, lp], axis=1)
    out = out @ W_affine.T + b_affine
    mean = jnp.mean(out, axis=0, keepdims=True)
    var = jnp.mean((out - mean) ** 2, axis=0, keepdims=True)
    out = (out - mean) / jnp.sqrt(var + 1e-5)
    return out * gamma + beta


if __name__ == "__main__":
    # small, module-consistent shapes (batch > tile to exercise the grid + BN reduction)
    B, N, E = 200, 4, 8            # batch, num_fields, embedding_dim
    D_out = 16                     # block_out_dim
    P = N * (N - 1) // 2           # 6
    in_concat = N + P              # 10

    key = jax.random.PRNGKey(0)
    k_x, k_wz, k_wp, k_wa, k_ba = jax.random.split(key, 5)

    x = jax.random.normal(k_x, (B, N * E), dtype=jnp.float32)
    W_z = jax.random.normal(k_wz, (N, N, E), dtype=jnp.float32)
    W_p = jax.random.normal(k_wp, (P, N, N), dtype=jnp.float32)
    bound = 1.0 / (in_concat ** 0.5)
    W_affine = jax.random.uniform(k_wa, (D_out, in_concat),
                                  minval=-bound, maxval=bound, dtype=jnp.float32)
    b_affine = jax.random.uniform(k_ba, (D_out,),
                                  minval=-bound, maxval=bound, dtype=jnp.float32)
    gamma = jnp.ones((D_out,), dtype=jnp.float32)   # BatchNorm1d weight init
    beta = jnp.zeros((D_out,), dtype=jnp.float32)   # BatchNorm1d bias init

    # f32 path (exactness check); small tile_b so the test covers multiple grid
    # tiles and the cross-tile BN statistics reduction.
    out = outer_product_forward(x, W_z, W_p, W_affine, b_affine, gamma, beta,
                                num_fields=N, embedding_dim=E, tile_b=64)
    out = jax.block_until_ready(out)

    ref = reference_forward(x, W_z, W_p, W_affine, b_affine, gamma, beta, N, E)
    assert out.shape == (B, D_out)
    assert jnp.allclose(out, ref, atol=2e-3, rtol=2e-3), (
        "mismatch vs reference, max abs diff = "
        f"{float(jnp.max(jnp.abs(out - ref)))}")

    # bf16 MXU-operand path (halves the x HBM read on v5e/v6e/v7x); sanity run.
    out_bf16 = outer_product_forward(x, W_z, W_p, W_affine, b_affine, gamma, beta,
                                     num_fields=N, embedding_dim=E, tile_b=64,
                                     mxu_dtype=jnp.bfloat16)
    out_bf16 = jax.block_until_ready(out_bf16)
    assert out_bf16.shape == (B, D_out)
    assert bool(jnp.all(jnp.isfinite(out_bf16)))

    print("KERNEL_OK")
</pallas_src>

<mosaic_0001>
module attributes {stable_mosaic.version = 11 : i64} {
  func.func @stats_kernel(%arg0: i32, %arg1: memref<8x256xf32, #tpu.memory_space<vmem>>, %arg2: memref<256x384xf32, #tpu.memory_space<vmem>>, %arg3: memref<128x128xf32, #tpu.memory_space<vmem>>, %arg4: memref<1x2x128xf32, #tpu.memory_space<vmem>>) attributes {dimension_semantics = [#tpu.dimension_semantics<parallel>], iteration_bounds = array<i64: 4>, scalar_prefetch = 0 : i64, scratch_operands = 0 : i64, tpu.core_type = #tpu.core_type<tc>, window_params = [{transform_indices = @transform_0, window_bounds = array<i64: 8, 256>}, {pipeline_mode = #tpu.pipeline_mode<synchronous>, transform_indices = @transform_1, window_bounds = array<i64: 256, 384>}, {pipeline_mode = #tpu.pipeline_mode<synchronous>, transform_indices = @transform_2, window_bounds = array<i64: 128, 128>}, {transform_indices = @transform_3, window_bounds = array<i64: 1, 2, 128>}]} {
    %c0 = arith.constant 0 : index
    %c0_0 = arith.constant 0 : index
    %0 = vector.load %arg1[%c0, %c0_0] : memref<8x256xf32, #tpu.memory_space<vmem>>, vector<8x256xf32>
    %c0_1 = arith.constant 0 : index
    %c0_2 = arith.constant 0 : index
    %1 = vector.load %arg2[%c0_1, %c0_2] : memref<256x384xf32, #tpu.memory_space<vmem>>, vector<256x384xf32>
    %cst = arith.constant dense<0.000000e+00> : vector<8x384xf32>
    %2 = tpu.matmul %0, %1, %cst {dimension_numbers = #tpu.dot_dimension_numbers<[1], [0], [0], [1], [0, 0, 1, 1], [], []>} : vector<8x256xf32>, vector<256x384xf32>, vector<8x384xf32> -> vector<8x384xf32>
    %3 = vector.extract_strided_slice %2 {offsets = [0, 0], sizes = [8, 128], strides = [1, 1]} : vector<8x384xf32> to vector<8x128xf32>
    %4 = vector.extract_strided_slice %2 {offsets = [0, 128], sizes = [8, 128], strides = [1, 1]} : vector<8x384xf32> to vector<8x128xf32>
    %5 = vector.extract_strided_slice %2 {offsets = [0, 256], sizes = [8, 128], strides = [1, 1]} : vector<8x384xf32> to vector<8x128xf32>
    %6 = arith.mulf %4, %5 : vector<8x128xf32>
    %c0_3 = arith.constant 0 : index
    %c0_4 = arith.constant 0 : index
    %7 = vector.load %arg3[%c0_3, %c0_4] : memref<128x128xf32, #tpu.memory_space<vmem>>, vector<128x128xf32>
    %cst_5 = arith.constant dense<0.000000e+00> : vector<8x128xf32>
    %8 = tpu.matmul %6, %7, %cst_5 {dimension_numbers = #tpu.dot_dimension_numbers<[1], [0], [0], [1], [0, 0, 1, 1], [], []>} : vector<8x128xf32>, vector<128x128xf32>, vector<8x128xf32> -> vector<8x128xf32>
    %9 = arith.addf %3, %8 : vector<8x128xf32>
    %cst_6 = arith.constant dense<0.000000e+00> : vector<128xf32>
    %10 = vector.multi_reduction <add>, %9, %cst_6 [0] : vector<8x128xf32> to vector<128xf32>
    %11 = vector.shape_cast %10 : vector<128xf32> to vector<1x128xf32>
    %12 = arith.mulf %9, %9 : vector<8x128xf32>
    %cst_7 = arith.constant dense<0.000000e+00> : vector<128xf32>
    %13 = vector.multi_reduction <add>, %12, %cst_7 [0] : vector<8x128xf32> to vector<128xf32>
    %14 = vector.shape_cast %13 : vector<128xf32> to vector<1x128xf32>
    %15 = tpu.concatenate %11, %14 in 0 : vector<1x128xf32>, vector<1x128xf32> -> vector<2x128xf32>
    %c0_8 = arith.constant 0 : index
    %c0_9 = arith.constant 0 : index
    %c0_10 = arith.constant 0 : index
    %16 = vector.load %arg4[%c0_8, %c0_9, %c0_10] : memref<1x2x128xf32, #tpu.memory_space<vmem>>, vector<1x2x128xf32>
    %17 = vector.shape_cast %16 : vector<1x2x128xf32> to vector<2x128xf32>
    %18 = vector.shape_cast %15 : vector<2x128xf32> to vector<1x2x128xf32>
    tpu.vector_store %arg4[%c0_8, %c0_9, %c0_10], %18 {strides = array<i32>} : memref<1x2x128xf32, #tpu.memory_space<vmem>>, vector<1x2x128xf32>,
    return
  }
  func.func @transform_0(%arg0: i32) -> (i32, i32) {
    %c0_i32 = arith.constant 0 : i32
    %c0_i32_0 = arith.constant 0 : i32
    return %arg0, %c0_i32 : i32, i32
  }
  func.func @transform_1(%arg0: i32) -> (i32, i32) {
    %c0_i32 = arith.constant 0 : i32
    %c0_i32_0 = arith.constant 0 : i32
    %c0_i32_1 = arith.constant 0 : i32
    return %c0_i32, %c0_i32_0 : i32, i32
  }
  func.func @transform_2(%arg0: i32) -> (i32, i32) {
    %c0_i32 = arith.constant 0 : i32
    %c0_i32_0 = arith.constant 0 : i32
    %c0_i32_1 = arith.constant 0 : i32
    return %c0_i32, %c0_i32_0 : i32, i32
  }
  func.func @transform_3(%arg0: i32) -> (i32, i32, i32) {
    %c0_i32 = arith.constant 0 : i32
    %c0_i32_0 = arith.constant 0 : i32
    %c0_i32_1 = arith.constant 0 : i32
    return %arg0, %c0_i32, %c0_i32_0 : i32, i32, i32
  }
}

module attributes {stable_mosaic.version = 11 : i64} {
  func.func @apply_kernel(%arg0: i32, %arg1: memref<8x256xf32, #tpu.memory_space<vmem>>, %arg2: memref<256x384xf32, #tpu.memory_space<vmem>>, %arg3: memref<128x128xf32, #tpu.memory_space<vmem>>, %arg4: memref<1x128xf32, #tpu.memory_space<vmem>>, %arg5: memref<1x128xf32, #tpu.memory_space<vmem>>, %arg6: memref<8x128xf32, #tpu.memory_space<vmem>>) attributes {dimension_semantics = [#tpu.dimension_semantics<parallel>], iteration_bounds = array<i64: 4>, scalar_prefetch = 0 : i64, scratch_operands = 0 : i64, tpu.core_type = #tpu.core_type<tc>, window_params = [{transform_indices = @transform_0, window_bounds = array<i64: 8, 256>}, {pipeline_mode = #tpu.pipeline_mode<synchronous>, transform_indices = @transform_1, window_bounds = array<i64: 256, 384>}, {pipeline_mode = #tpu.pipeline_mode<synchronous>, transform_indices = @transform_2, window_bounds = array<i64: 128, 128>}, {pipeline_mode = #tpu.pipeline_mode<synchronous>, transform_indices = @transform_3, window_bounds = array<i64: 1, 128>}, {pipeline_mode = #tpu.pipeline_mode<synchronous>, transform_indices = @transform_4, window_bounds = array<i64: 1, 128>}, {transform_indices = @transform_5, window_bounds = array<i64: 8, 128>}]} {
    %c0 = arith.constant 0 : index
    %c0_0 = arith.constant 0 : index
    %0 = vector.load %arg1[%c0, %c0_0] : memref<8x256xf32, #tpu.memory_space<vmem>>, vector<8x256xf32>
    %c0_1 = arith.constant 0 : index
    %c0_2 = arith.constant 0 : index
    %1 = vector.load %arg2[%c0_1, %c0_2] : memref<256x384xf32, #tpu.memory_space<vmem>>, vector<256x384xf32>
    %cst = arith.constant dense<0.000000e+00> : vector<8x384xf32>
    %2 = tpu.matmul %0, %1, %cst {dimension_numbers = #tpu.dot_dimension_numbers<[1], [0], [0], [1], [0, 0, 1, 1], [], []>} : vector<8x256xf32>, vector<256x384xf32>, vector<8x384xf32> -> vector<8x384xf32>
    %3 = vector.extract_strided_slice %2 {offsets = [0, 0], sizes = [8, 128], strides = [1, 1]} : vector<8x384xf32> to vector<8x128xf32>
    %4 = vector.extract_strided_slice %2 {offsets = [0, 128], sizes = [8, 128], strides = [1, 1]} : vector<8x384xf32> to vector<8x128xf32>
    %5 = vector.extract_strided_slice %2 {offsets = [0, 256], sizes = [8, 128], strides = [1, 1]} : vector<8x384xf32> to vector<8x128xf32>
    %6 = arith.mulf %4, %5 : vector<8x128xf32>
    %c0_3 = arith.constant 0 : index
    %c0_4 = arith.constant 0 : index
    %7 = vector.load %arg3[%c0_3, %c0_4] : memref<128x128xf32, #tpu.memory_space<vmem>>, vector<128x128xf32>
    %cst_5 = arith.constant dense<0.000000e+00> : vector<8x128xf32>
    %8 = tpu.matmul %6, %7, %cst_5 {dimension_numbers = #tpu.dot_dimension_numbers<[1], [0], [0], [1], [0, 0, 1, 1], [], []>} : vector<8x128xf32>, vector<128x128xf32>, vector<8x128xf32> -> vector<8x128xf32>
    %9 = arith.addf %3, %8 : vector<8x128xf32>
    %c0_6 = arith.constant 0 : index
    %c0_7 = arith.constant 0 : index
    %10 = vector.load %arg4[%c0_6, %c0_7] : memref<1x128xf32, #tpu.memory_space<vmem>>, vector<1x128xf32>
    %11 = vector.broadcast %10 : vector<1x128xf32> to vector<8x128xf32>
    %12 = arith.mulf %9, %11 : vector<8x128xf32>
    %c0_8 = arith.constant 0 : index
    %c0_9 = arith.constant 0 : index
    %13 = vector.load %arg5[%c0_8, %c0_9] : memref<1x128xf32, #tpu.memory_space<vmem>>, vector<1x128xf32>
    %14 = vector.broadcast %13 : vector<1x128xf32> to vector<8x128xf32>
    %15 = arith.addf %12, %14 : vector<8x128xf32>
    %c0_10 = arith.constant 0 : index
    %c0_11 = arith.constant 0 : index
    %16 = vector.load %arg6[%c0_10, %c0_11] : memref<8x128xf32, #tpu.memory_space<vmem>>, vector<8x128xf32>
    tpu.vector_store %arg6[%c0_10, %c0_11], %15 {strides = array<i32>} : memref<8x128xf32, #tpu.memory_space<vmem>>, vector<8x128xf32>,
    return
  }
  func.func @transform_0(%arg0: i32) -> (i32, i32) {
    %c0_i32 = arith.constant 0 : i32
    %c0_i32_0 = arith.constant 0 : i32
    return %arg0, %c0_i32 : i32, i32
  }
  func.func @transform_1(%arg0: i32) -> (i32, i32) {
    %c0_i32 = arith.constant 0 : i32
    %c0_i32_0 = arith.constant 0 : i32
    %c0_i32_1 = arith.constant 0 : i32
    return %c0_i32, %c0_i32_0 : i32, i32
  }
  func.func @transform_2(%arg0: i32) -> (i32, i32) {
    %c0_i32 = arith.constant 0 : i32
    %c0_i32_0 = arith.constant 0 : i32
    %c0_i32_1 = arith.constant 0 : i32
    return %c0_i32, %c0_i32_0 : i32, i32
  }
  func.func @transform_3(%arg0: i32) -> (i32, i32) {
    %c0_i32 = arith.constant 0 : i32
    %c0_i32_0 = arith.constant 0 : i32
    %c0_i32_1 = arith.constant 0 : i32
    return %c0_i32, %c0_i32_0 : i32, i32
  }
  func.func @transform_4(%arg0: i32) -> (i32, i32) {
    %c0_i32 = arith.constant 0 : i32
    %c0_i32_0 = arith.constant 0 : i32
    %c0_i32_1 = arith.constant 0 : i32
    return %c0_i32, %c0_i32_0 : i32, i32
  }
  func.func @transform_5(%arg0: i32) -> (i32, i32) {
    %c0_i32 = arith.constant 0 : i32
    %c0_i32_0 = arith.constant 0 : i32
    return %arg0, %c0_i32 : i32, i32
  }
}

</mosaic_0001>

<bundles_post_ra>
// kernel: tile.21
= control target key start
LH: loop header
LB: loop body
LE: loop exit
PB: predicated region body
PF: predicated region fallthrough
CT: control target
= control target key end

     0   :  { %s22_s0 = inlined_call_operand.vmem [shape: f32[16], index: 0, kind: input, shape index: {}]   ;;  %s23_s1 = inlined_call_operand.vmem [shape: f32[8,16], index: 1, kind: output, shape index: {}]  }
   0x1   :  { %v4_v0 = vld [vmem:[%s22_s0] ss:$0 sm:$0xff] }
   0x2   :  { %5 = vst [vmem:[%s23_s1] sm:$0xff] %v4_v0 }

// kernel: tile.22
= control target key start
LH: loop header
LB: loop body
LE: loop exit
PB: predicated region body
PF: predicated region fallthrough
CT: control target
= control target key end

     0   :  { %s67_s10 = smov 112   ;;  %s68_s11 = smov 80   ;;  %vm3_vm0 = vcmask 130048   ;;  %vm9_vm1 = vcmask 1048448   ;;  %vm15_vm2 = vcmask 917248   ;;  %vm21_vm3 = vcmask 786048   ;;  %s111_s0 = inlined_call_operand.vmem [shape: f32[8,16], index: 0, kind: input, shape index: {}]   ;;  %s112_s1 = inlined_call_operand.vmem [shape: f32[1,128], index: 1, kind: output, shape index: {}]  }
   0x1   :  { %v53_v0 = vld [vmem:[%s111_s0 + $0x7] sm:$0x1]   ;;  %v55_v1 = vld [vmem:[%s111_s0 + $0x5] sm:$0x1]   ;;  %v54_v2 = vld [vmem:[%s111_s0 + $0x6] sm:$0x1]  }
   0x2   :  { %7 = vrot.lane.b32.xlu0 %v53_v0, %s67_s10  ;;  %19 = vrot.lane.b32.xlu1 %v55_v1, %s68_s11  ;;  %v56_v3 = vld [vmem:[%s111_s0 + $0x4] sm:$0x1]   ;;  %v2_v4 = vld [vmem:[%s111_s0] sm:$0x1]   ;;  %s69_s18 = smov 96   ;;  %s70_s19 = smov 64  }
   0x3   :  { %4 = vst.msk [vmem:[#allocation0] sm:$0x1] %vm3_vm0, %v2_v4   ;;  %v57_v5 = vld [vmem:[%s111_s0 + $0x3] sm:$0x1]   ;;  %v58_v6 = vld [vmem:[%s111_s0 + $0x2] sm:$0x1]  }
   0x4   :  { %s71_s24 = smov 48   ;;  %s72_s25 = smov 32   ;;  %v59_v7 = vld [vmem:[%s111_s0 + $0x1] sm:$0x1]   ;;  %vm27_vm4 = vcmask 654848   ;;  %vm33_vm5 = vcmask 523648  }
   0x5   :  { %s73_s0 = smov 16   ;;  %vm39_vm6 = vcmask 392448   ;;  %vm45_vm7 = vcmask 261248  }
   0x6   :  { %13 = vrot.lane.b32.xlu0 %v54_v2, %s69_s18  ;;  %25 = vrot.lane.b32.xlu1 %v56_v3, %s70_s19 }
   0xa   :  { %31 = vrot.lane.b32.xlu0 %v57_v5, %s71_s24  ;;  %37 = vrot.lane.b32.xlu1 %v58_v6, %s72_s25 }
   0xe   :  { %43 = vrot.lane.b32.xlu0 %v59_v7, %s73_s0 }
  0x74   :  { %v8_v8 = vpop.permute.xlu0 %7   ;;  %v20_v9 = vpop.permute.xlu1 %19  }
  0x75   :  { %10 = vst.msk [vmem:[#allocation0] sm:$0x1] %vm9_vm1, %v8_v8  }
  0x78   :  { %v14_v10 = vpop.permute.xlu0 %13   ;;  %v26_v11 = vpop.permute.xlu1 %25  }
  0x79   :  { %16 = vst.msk [vmem:[#allocation0] sm:$0x1] %vm15_vm2, %v14_v10  }
  0x7a   :  { %22 = vst.msk [vmem:[#allocation0] sm:$0x1] %vm21_vm3, %v20_v9  }
  0x7b   :  { %28 = vst.msk [vmem:[#allocation0] sm:$0x1] %vm27_vm4, %v26_v11  }
  0x7c   :  { %v32_v12 = vpop.permute.xlu0 %31   ;;  %v38_v13 = vpop.permute.xlu1 %37  }
  0x7d   :  { %34 = vst.msk [vmem:[#allocation0] sm:$0x1] %vm33_vm5, %v32_v12  }
  0x7e   :  { %40 = vst.msk [vmem:[#allocation0] sm:$0x1] %vm39_vm6, %v38_v13  }
  0x80   :  { %v44_v14 = vpop.permute.xlu0 %43  }
  0x81   :  { %46 = vst.msk [vmem:[#allocation0] sm:$0x1] %vm45_vm7, %v44_v14  }
  0x88   :  { %v50_v15 = vld [vmem:[#allocation0] sm:$0x1] }
  0x89   :  { %52 = vst [vmem:[%s112_s1] sm:$0x1] %v50_v15 }

// kernel: outer_product_forward.3
= control target key start
LH: loop header
LB: loop body
LE: loop exit
PB: predicated region body
PF: predicated region fallthrough
CT: control target
= control target key end

     0   :  { %s892_s18 = smov 0   ;;  %s1281_s0 = inlined_call_operand.vmem [shape: f32[32,256], index: 0, kind: input, shape index: {}]   ;;  %s1282_s1 = inlined_call_operand.vmem [shape: f32[256,384], index: 1, kind: input, shape index: {}]   ;;  %s1283_s2 = inlined_call_operand.vmem [shape: f32[128,128], index: 2, kind: input, shape index: {}]   ;;  %s1284_s3 = inlined_call_operand.vmem [shape: f32[1,128], index: 3, kind: input, shape index: {}]   ;;  %s1285_s4 = inlined_call_operand.vmem [shape: f32[1,128], index: 4, kind: input, shape index: {}]   ;;  %s1286_s5 = inlined_call_operand.vmem [shape: f32[32,128], index: 5, kind: output, shape index: {}]  }
   0x1 LB: > { %s620_s19 = sadd.s32 4294967295, %s857_s18   ;;  %p624_p0 = scmp.ge.s32.totalorder %s857_s18, 1  ;;  %s857_s18 = sphi %s892_s18, %s15_s18  }
   0x2   : > { %p187_p1 = scmp.lt.s32.totalorder %s857_s18, 5 }
   0x4   : > { %p188_p2 = pnand %p624_p0, %p187_p1 }
   0x5   : > { %v226_v0 = vld [vmem:[%s1282_s1 + $0x8] sm:$0xff] (!%p188_p2)  ;;  %v229_v1 = vld [vmem:[%s1282_s1 + $0x20] sm:$0xff] (!%p188_p2)  ;;  %v228_v4 = vld [vmem:[%s1282_s1 + $0x18] sm:$0xff] (!%p188_p2)  ;;  %p1010_p3 = scmp.lt.s32.totalorder (!%p188_p2), %s620_s19, 3  ;;  %vm860_vm0 = vmmov (!%p188_p2), 0  }
   0x6   : > { %191 = sbr.rel (%p188_p2) target bundleno = 506 (0x1fa), region = 40  ;;  %v225_v2 = vld [vmem:[%s1282_s1] sm:$0xff] (!%p188_p2)  ;;  %v720_v3 = vpack.c.bf16 (!%p188_p2), %v229_v1, %v226_v0  ;;  %v232_v5 = vld [vmem:[%s1282_s1 + $0x38] sm:$0xff] (!%p188_p2)  ;;  %v235_v6 = vld [vmem:[%s1282_s1 + $0x50] sm:$0xff] (!%p188_p2) }
   0x7   : > { %v722_v7 = vpack.c.bf16 (!%p188_p2), %v228_v4, %v225_v2  ;;  %v724_v8 = vpack.c.bf16 (!%p188_p2), %v235_v6, %v232_v5  ;;  %v231_v9 = vld [vmem:[%s1282_s1 + $0x30] sm:$0xff] (!%p188_p2)  ;;  %v234_v10 = vld [vmem:[%s1282_s1 + $0x48] sm:$0xff] (!%p188_p2)  ;;  %v241_v12 = vld [vmem:[%s1282_s1 + $0x80] sm:$0xff] (!%p188_p2) }
   0x8   : > { %v238_v11 = vld [vmem:[%s1282_s1 + $0x68] sm:$0xff] (!%p188_p2)  ;;  %721 = vmatprep.subr.bf16.mxu0 (!%p188_p2), %v720_v3  ;;  %v726_v13 = vpack.c.bf16 (!%p188_p2), %v234_v10, %v231_v9  ;;  %v237_v15 = vld [vmem:[%s1282_s1 + $0x60] sm:$0xff] (!%p188_p2)  ;;  %v240_v16 = vld [vmem:[%s1282_s1 + $0x78] sm:$0xff] (!%p188_p2) }
   0x9   : > { %723 = vmatpush1.bf16.msra.mxu0 (!%p188_p2), %v722_v7  ;;  %v728_v14 = vpack.c.bf16 (!%p188_p2), %v241_v12, %v238_v11  ;;  %v244_v17 = vld [vmem:[%s1282_s1 + $0x98] sm:$0xff] (!%p188_p2)  ;;  %v247_v18 = vld [vmem:[%s1282_s1 + $0xb0] sm:$0xff] (!%p188_p2)  ;;  %v730_v19 = vpack.c.bf16 (!%p188_p2), %v240_v16, %v237_v15  ;;  %v246_v22 = vld [vmem:[%s1282_s1 + $0xa8] sm:$0xff] (!%p188_p2) }
   0xa   : > { %725 = vmatprep.subr.bf16.mxu0 (!%p188_p2), %v724_v8  ;;  %v732_v20 = vpack.c.bf16 (!%p188_p2), %v247_v18, %v244_v17  ;;  %v243_v21 = vld [vmem:[%s1282_s1 + $0x90] sm:$0xff] (!%p188_p2)  ;;  %v250_v23 = vld [vmem:[%s1282_s1 + $0xc8] sm:$0xff] (!%p188_p2)  ;;  %v253_v24 = vld [vmem:[%s1282_s1 + $0xe0] sm:$0xff] (!%p188_p2) }
   0xb   : > { %v275_v25 = vld [vmem:[%s1282_s1 + $0x190] sm:$0xff] (!%p188_p2)  ;;  %v278_v26 = vld [vmem:[%s1282_s1 + $0x1a8] sm:$0xff] (!%p188_p2)  ;;  %v734_v29 = vpack.c.bf16 (!%p188_p2), %v246_v22, %v243_v21  ;;  %v249_v30 = vld [vmem:[%s1282_s1 + $0xc0] sm:$0xff] (!%p188_p2)  ;;  %v736_v34 = vpack.c.bf16 (!%p188_p2), %v253_v24, %v250_v23 }
   0xc   : > { %v227_v27 = vld [vmem:[%s1282_s1 + $0x10] sm:$0xff] (!%p188_p2)  ;;  %v230_v28 = vld [vmem:[%s1282_s1 + $0x28] sm:$0xff] (!%p188_p2)  ;;  %v252_v31 = vld [vmem:[%s1282_s1 + $0xd8] sm:$0xff] (!%p188_p2)  ;;  %v784_v32 = vpack.c.bf16 (!%p188_p2), %v278_v26, %v275_v25 }
   0xd   : > { %727 = vmatpush1.bf16.msra.mxu0 %v726_v13  ;;  %v786_v33 = vpack.c.bf16 %v230_v28, %v227_v27  ;;  %v256_v35 = vld [vmem:[%s1282_s1 + $0xf8] sm:$0xff]  ;;  %v281_v36 = vld [vmem:[%s1282_s1 + $0x1c0] sm:$0xff]  ;;  %v259_v38 = vld [vmem:[%s1282_s1 + $0x110] sm:$0xff]  ;;  %v738_v43 = vpack.c.bf16 %v252_v31, %v249_v30  ;;  %s1289_s19 = smov (!%p1010_p3, %s620_s19), 3 }
   0xe   : > { %729 = vmatprep.subr.bf16.mxu0 %v728_v14  ;;  %v284_v37 = vld [vmem:[%s1282_s1 + $0x1d8] sm:$0xff]  ;;  %785 = vmatprep.subr.bf16.mxu1 %v784_v32  ;;  %v233_v40 = vld [vmem:[%s1282_s1 + $0x40] sm:$0xff]  ;;  %v287_v44 = vld [vmem:[%s1282_s1 + $0x1f0] sm:$0xff]  ;;  %v740_v47 = vpack.c.bf16 %v259_v38, %v256_v35  ;;  %s632_s12 = sshll.u32 %s1289_s19, 4  ;;  %s627_s22 = sshll.u32 %s1289_s19, 3 }
   0xf   : > { %v788_v39 = vpack.c.bf16 %v284_v37, %v281_v36  ;;  %v236_v41 = vld [vmem:[%s1282_s1 + $0x58] sm:$0xff]  ;;  %787 = vmatpush3.bf16.msra.mxu1 %v786_v33  ;;  %v290_v45 = vld [vmem:[%s1282_s1 + $0x208] sm:$0xff]  ;;  %v239_v46 = vld [vmem:[%s1282_s1 + $0x70] sm:$0xff]  ;;  %s1093_s23 = scalar_lea.vmem %s1281_s0, %s632_s12  ;;  %s222_s28 = scalar_lea.vmem %s1286_s5, %s627_s22 }
  0x10   : > { %v790_v42 = vpack.c.bf16 %v236_v41, %v233_v40  ;;  %v255_v48 = vld [vmem:[%s1282_s1 + $0xf0] sm:$0xff]  ;;  %v258_v49 = vld [vmem:[%s1282_s1 + $0x108] sm:$0xff]  ;;  %v792_v50 = vpack.c.bf16 %v290_v45, %v287_v44  ;;  %v265_v53 = vld [vmem:[%s1282_s1 + $0x140] sm:$0xff] }
  0x11   : > { %731 = vmatpush1.bf16.msra.mxu0 %v730_v19  ;;  %789 = vmatprep.subr.bf16.mxu1 %v788_v39  ;;  %v242_v51 = vld [vmem:[%s1282_s1 + $0x88] sm:$0xff]  ;;  %v293_v54 = vld [vmem:[%s1282_s1 + $0x220] sm:$0xff]  ;;  %v296_v56 = vld [vmem:[%s1282_s1 + $0x238] sm:$0xff]  ;;  %v742_v57 = vpack.c.bf16 %v258_v49, %v255_v48 }
  0x12   : > { %733 = vmatprep.subr.bf16.mxu0 %v732_v20  ;;  %v262_v52 = vld [vmem:[%s1282_s1 + $0x128] sm:$0xff]  ;;  %v794_v55 = vpack.c.bf16 %v242_v51, %v239_v46  ;;  %v261_v58 = vld [vmem:[%s1282_s1 + $0x120] sm:$0xff]  ;;  %v796_v59 = vpack.c.bf16 %v296_v56, %v293_v54  ;;  %v248_v61 = vld [vmem:[%s1282_s1 + $0xb8] sm:$0xff] }
  0x13   : > { %791 = vmatpush3.bf16.msra.mxu1 %v790_v42  ;;  %v245_v60 = vld [vmem:[%s1282_s1 + $0xa0] sm:$0xff]  ;;  %v744_v62 = vpack.c.bf16 %v265_v53, %v262_v52  ;;  %v264_v63 = vld [vmem:[%s1282_s1 + $0x138] sm:$0xff]  ;;  %v299_v0 = vld [vmem:[%s1282_s1 + $0x250] sm:$0xff] }
  0x14   : > { %793 = vmatprep.subr.bf16.mxu1 %v792_v50  ;;  %v302_v1 = vld [vmem:[%s1282_s1 + $0x268] sm:$0xff]  ;;  %v268_v2 = vld [vmem:[%s1282_s1 + $0x158] sm:$0xff]  ;;  %v271_v3 = vld [vmem:[%s1282_s1 + $0x170] sm:$0xff]  ;;  %v798_v4 = vpack.c.bf16 %v248_v61, %v245_v60  ;;  %v746_v5 = vpack.c.bf16 %v264_v63, %v261_v58  ;;  %v859_v63 = vmov 0.0|0.0  }
  0x15   : > { %735 = vmatpush1.bf16.msra.mxu0 %v734_v29  ;;  %v267_v6 = vld [vmem:[%s1282_s1 + $0x150] sm:$0xff]  ;;  %v800_v7 = vpack.c.bf16 %v302_v1, %v299_v0  ;;  %v254_v9 = vld [vmem:[%s1282_s1 + $0xe8] sm:$0xff]  ;;  %v748_v10 = vpack.c.bf16 %v271_v3, %v268_v2  ;;  %v305_v12 = vld [vmem:[%s1282_s1 + $0x280] sm:$0xff] }
  0x16   : > { %737 = vmatprep.subr.bf16.mxu0 %v736_v34  ;;  %v251_v8 = vld [vmem:[%s1282_s1 + $0xd0] sm:$0xff]  ;;  %v270_v11 = vld [vmem:[%s1282_s1 + $0x168] sm:$0xff]  ;;  %v308_v13 = vld [vmem:[%s1282_s1 + $0x298] sm:$0xff] }
  0x17   : > { %795 = vmatpush3.bf16.msra.mxu1 %v794_v55  ;;  %v274_v14 = vld [vmem:[%s1282_s1 + $0x188] sm:$0xff]  ;;  %v277_v15 = vld [vmem:[%s1282_s1 + $0x1a0] sm:$0xff]  ;;  %v802_v16 = vpack.c.bf16 %v254_v9, %v251_v8  ;;  %v750_v17 = vpack.c.bf16 %v270_v11, %v267_v6  ;;  %v804_v19 = vpack.c.bf16 %v308_v13, %v305_v12  ;;  %v260_v21 = vld [vmem:[%s1282_s1 + $0x118] sm:$0xff] }
  0x18   : > { %797 = vmatprep.subr.bf16.mxu1 %v796_v59  ;;  %v273_v18 = vld [vmem:[%s1282_s1 + $0x180] sm:$0xff]  ;;  %v752_v22 = vpack.c.bf16 %v277_v15, %v274_v14  ;;  %v276_v23 = vld [vmem:[%s1282_s1 + $0x198] sm:$0xff]  ;;  %v311_v24 = vld [vmem:[%s1282_s1 + $0x2b0] sm:$0xff] }
  0x19   : > { %739 = vmatpush1.bf16.msra.mxu0 %v738_v43  ;;  %v257_v20 = vld [vmem:[%s1282_s1 + $0x100] sm:$0xff]  ;;  %v314_v25 = vld [vmem:[%s1282_s1 + $0x2c8] sm:$0xff]  ;;  %v280_v26 = vld [vmem:[%s1282_s1 + $0x1b8] sm:$0xff]  ;;  %v754_v30 = vpack.c.bf16 %v276_v23, %v273_v18 }
  0x1a   : > { %741 = vmatprep.subr.bf16.mxu0 %v740_v47  ;;  %v283_v27 = vld [vmem:[%s1282_s1 + $0x1d0] sm:$0xff]  ;;  %v806_v28 = vpack.c.bf16 %v260_v21, %v257_v20  ;;  %v224_v29 = vld [vmem:[%s1093_s23 + $0x8] sm:$0xff]  ;;  %v808_v32 = vpack.c.bf16 %v314_v25, %v311_v24  ;;  %v317_v37 = vld [vmem:[%s1282_s1 + $0x2e0] sm:$0xff] }
  0x1b   : > { %799 = vmatpush3.bf16.msra.mxu1 %v798_v4  ;;  %v279_v31 = vld [vmem:[%s1282_s1 + $0x1b0] sm:$0xff]  ;;  %v266_v34 = vld [vmem:[%s1282_s1 + $0x148] sm:$0xff]  ;;  %v756_v35 = vpack.c.bf16 %v283_v27, %v280_v26  ;;  %v320_v38 = vld [vmem:[%s1282_s1 + $0x2f8] sm:$0xff]  ;;  %456 = vmatprep.mubr.f32.mxu1 %v224_v29 }
  0x1c   : > { %801 = vmatprep.subr.bf16.mxu1 %v800_v7  ;;  %v263_v33 = vld [vmem:[%s1282_s1 + $0x130] sm:$0xff]  ;;  %v282_v36 = vld [vmem:[%s1282_s1 + $0x1c8] sm:$0xff]  ;;  %v289_v40 = vld [vmem:[%s1282_s1 + $0x200] sm:$0xff]  ;;  %385 = vmatprep.mubr.f32.mxu0 %v224_v29  ;;  %v812_v43 = vpack.c.bf16 %v320_v38, %v317_v37 }
  0x1d   : > { %743 = vmatpush1.bf16.msra.mxu0 %v742_v57  ;;  %v286_v39 = vld [vmem:[%s1282_s1 + $0x1e8] sm:$0xff]  ;;  %v810_v41 = vpack.c.bf16 %v266_v34, %v263_v33  ;;  %v758_v42 = vpack.c.bf16 %v282_v36, %v279_v31  ;;  %v269_v44 = vld [vmem:[%s1282_s1 + $0x160] sm:$0xff]  ;;  %v272_v45 = vld [vmem:[%s1282_s1 + $0x178] sm:$0xff] }
  0x1e   : > { %745 = vmatprep.subr.bf16.mxu0 %v744_v62  ;;  %v760_v46 = vpack.c.bf16 %v289_v40, %v286_v39  ;;  %v285_v47 = vld [vmem:[%s1282_s1 + $0x1e0] sm:$0xff]  ;;  %v288_v48 = vld [vmem:[%s1282_s1 + $0x1f8] sm:$0xff]  ;;  %v295_v50 = vld [vmem:[%s1282_s1 + $0x230] sm:$0xff]  ;;  %v814_v51 = vpack.c.bf16 %v272_v45, %v269_v44 }
  0x1f   : > { %803 = vmatpush3.bf16.msra.mxu1 %v802_v16  ;;  %v292_v49 = vld [vmem:[%s1282_s1 + $0x218] sm:$0xff]  ;;  %v762_v52 = vpack.c.bf16 %v288_v48, %v285_v47  ;;  %v463_v53 = vld [vmem:[%s1283_s2] sm:$0xff]  ;;  %v464_v54 = vld [vmem:[%s1283_s2 + $0x8] sm:$0xff] }
  0x20   : > { %805 = vmatprep.subr.bf16.mxu1 %v804_v19  ;;  %v764_v55 = vpack.c.bf16 %v295_v50, %v292_v49  ;;  %v291_v56 = vld [vmem:[%s1282_s1 + $0x210] sm:$0xff]  ;;  %v294_v57 = vld [vmem:[%s1282_s1 + $0x228] sm:$0xff]  ;;  %v301_v59 = vld [vmem:[%s1282_s1 + $0x260] sm:$0xff]  ;;  %v817_v61 = vpack.c.bf16 %v464_v54, %v463_v53 }
  0x21   : > { %747 = vmatpush1.bf16.msra.mxu0 %v746_v5  ;;  %v298_v58 = vld [vmem:[%s1282_s1 + $0x248] sm:$0xff]  ;;  %v1172_v60 = vld [vmem:[%s1093_s23] sm:$0xff]  ;;  %v766_v62 = vpack.c.bf16 %v294_v57, %v291_v56  ;;  %v465_v0 = vld [vmem:[%s1283_s2 + $0x10] sm:$0xff] }
  0x22   : > { %749 = vmatprep.subr.bf16.mxu0 %v748_v10  ;;  %v466_v1 = vld [vmem:[%s1283_s2 + $0x18] sm:$0xff]  ;;  %v768_v2 = vpack.c.bf16 %v301_v59, %v298_v58  ;;  %v297_v3 = vld [vmem:[%s1282_s1 + $0x240] sm:$0xff]  ;;  %v307_v6 = vld [vmem:[%s1282_s1 + $0x290] sm:$0xff] }
  0x23   : > { %807 = vmatpush3.bf16.msra.mxu1 %v806_v28  ;;  %v300_v4 = vld [vmem:[%s1282_s1 + $0x258] sm:$0xff]  ;;  %v820_v7 = vpack.c.bf16 %v466_v1, %v465_v0  ;;  %v467_v9 = vld [vmem:[%s1283_s2 + $0x20] sm:$0xff]  ;;  %v468_v10 = vld [vmem:[%s1283_s2 + $0x28] sm:$0xff] }
  0x24   : > { %809 = vmatprep.subr.bf16.mxu1 %v808_v32  ;;  %v304_v5 = vld [vmem:[%s1282_s1 + $0x278] sm:$0xff]  ;;  %v770_v8 = vpack.c.bf16 %v300_v4, %v297_v3  ;;  %v303_v12 = vld [vmem:[%s1282_s1 + $0x270] sm:$0xff]  ;;  %v306_v13 = vld [vmem:[%s1282_s1 + $0x288] sm:$0xff]  ;;  %v823_v16 = vpack.c.bf16 %v468_v10, %v467_v9 }
  0x25   : > { %751 = vmatpush1.bf16.msra.mxu0 %v750_v17  ;;  %v772_v11 = vpack.c.bf16 %v307_v6, %v304_v5  ;;  %v310_v14 = vld [vmem:[%s1282_s1 + $0x2a8] sm:$0xff]  ;;  %v313_v15 = vld [vmem:[%s1282_s1 + $0x2c0] sm:$0xff]  ;;  %v774_v17 = vpack.c.bf16 %v306_v13, %v303_v12  ;;  %v469_v18 = vld [vmem:[%s1283_s2 + $0x30] sm:$0xff] }
  0x26   : > { %753 = vmatprep.subr.bf16.mxu0 %v752_v22  ;;  %v470_v19 = vld [vmem:[%s1283_s2 + $0x38] sm:$0xff]  ;;  %v776_v20 = vpack.c.bf16 %v313_v15, %v310_v14  ;;  %v309_v21 = vld [vmem:[%s1282_s1 + $0x2a0] sm:$0xff]  ;;  %v319_v24 = vld [vmem:[%s1282_s1 + $0x2f0] sm:$0xff] }
  0x27   : > { %811 = vmatpush3.bf16.msra.mxu1 %v810_v41  ;;  %v312_v22 = vld [vmem:[%s1282_s1 + $0x2b8] sm:$0xff]  ;;  %v826_v25 = vpack.c.bf16 %v470_v19, %v469_v18  ;;  %v471_v27 = vld [vmem:[%s1283_s2 + $0x40] sm:$0xff]  ;;  %v472_v28 = vld [vmem:[%s1283_s2 + $0x48] sm:$0xff] }
  0x28   : > { %813 = vmatprep.subr.bf16.mxu1 %v812_v43  ;;  %v316_v23 = vld [vmem:[%s1282_s1 + $0x2d8] sm:$0xff]  ;;  %v778_v26 = vpack.c.bf16 %v312_v22, %v309_v21  ;;  %v318_v31 = vld [vmem:[%s1282_s1 + $0x2e8] sm:$0xff]  ;;  %v829_v32 = vpack.c.bf16 %v472_v28, %v471_v27  ;;  %v473_v34 = vld [vmem:[%s1283_s2 + $0x50] sm:$0xff]  ;;  %v861_v43 = vmov 0.0  }
  0x29   : > { %755 = vmatpush1.bf16.msra.mxu0 %v754_v30  ;;  %v780_v29 = vpack.c.bf16 %v319_v24, %v316_v23  ;;  %v315_v30 = vld [vmem:[%s1282_s1 + $0x2d0] sm:$0xff]  ;;  %v475_v37 = vld [vmem:[%s1283_s2 + $0x60] sm:$0xff]  ;;  %v476_v38 = vld [vmem:[%s1283_s2 + $0x68] sm:$0xff] }
  0x2a   : > { %757 = vmatprep.subr.bf16.mxu0 %v756_v35  ;;  %v782_v33 = vpack.c.bf16 %v318_v31, %v315_v30  ;;  %v474_v35 = vld [vmem:[%s1283_s2 + $0x58] sm:$0xff]  ;;  %v835_v39 = vpack.c.bf16 %v476_v38, %v475_v37  ;;  %v477_v40 = vld [vmem:[%s1283_s2 + $0x70] sm:$0xff]  ;;  %v629_v54 = vld [vmem:[%s1285_s4] ss:$0 sm:$0xff] }
  0x2b   : > { %815 = vmatpush3.bf16.msra.mxu1 %v814_v51  ;;  %v832_v36 = vpack.c.bf16 %v474_v35, %v473_v34  ;;  %v478_v41 = vld [vmem:[%s1283_s2 + $0x78] sm:$0xff]  ;;  %v628_v51 = vld [vmem:[%s1284_s3] ss:$0 sm:$0xff] }
  0x2c   : > { %816 = vmatprep.subr.bf16.mxu1 %v859_v63 }
  0x2d   : > { %759 = vmatpush1.bf16.msra.mxu0 %v758_v42  ;;  %v838_v42 = vpack.c.bf16 %v478_v41, %v477_v40 }
  0x2e   : > { %761 = vmatprep.subr.bf16.mxu0 %v760_v46  ;;  %457 = vmatmul.mubr.f32.vlgmr.msra.gmra.mrb[0].mxu1 %v1172_v60 }
  0x2f   : > { %818 = vmatpush3.bf16.msra.mxu1 %v817_v61  ;;  %717 = vmatprep.mubr.msk.f32.mxu1 %vm860_vm0, %v861_v43 }
  0x30   : > { %819 = vmatprep.subr.bf16.mxu1 %v859_v63 }
  0x31   : > { %763 = vmatpush1.bf16.msra.mxu0 %v762_v52 }
  0x32   : > { %765 = vmatprep.subr.bf16.mxu0 %v764_v55 }
  0x33   : > { %821 = vmatpush3.bf16.msra.mxu1 %v820_v7 }
  0x34   : > { %822 = vmatprep.subr.bf16.mxu1 %v859_v63 }
  0x35   : > { %767 = vmatpush1.bf16.msra.mxu0 %v766_v62 }
  0x36   : > { %769 = vmatprep.subr.bf16.mxu0 %v768_v2 }
  0x37   : > { %824 = vmatpush3.bf16.msra.mxu1 %v823_v16 }
  0x38   : > { %825 = vmatprep.subr.bf16.mxu1 %v859_v63 }
  0x39   : > { %771 = vmatpush1.bf16.msra.mxu0 %v770_v8 }
  0x3a   : > { %773 = vmatprep.subr.bf16.mxu0 %v772_v11 }
  0x3b   : > { %827 = vmatpush3.bf16.msra.mxu1 %v826_v25 }
  0x3c   : > { %828 = vmatprep.subr.bf16.mxu1 %v859_v63 }
  0x3d   : > { %775 = vmatpush1.bf16.msra.mxu0 %v774_v17 }
  0x3e   : > { %777 = vmatprep.subr.bf16.mxu0 %v776_v20 }
  0x3f   : > { %830 = vmatpush3.bf16.msra.mxu1 %v829_v32 }
  0x40   : > { %831 = vmatprep.subr.bf16.mxu1 %v859_v63 }
  0x41   : > { %779 = vmatpush1.bf16.msra.mxu0 %v778_v26 }
  0x42   : > { %781 = vmatprep.subr.bf16.mxu0 %v780_v29 }
  0x43   : > { %833 = vmatpush3.bf16.msra.mxu1 %v832_v36 }
  0x44   : > { %834 = vmatprep.subr.bf16.mxu1 %v859_v63 }
  0x45   : > { %783 = vmatpush1.bf16.msra.mxu0 %v782_v33 }
  0x47   : > { %836 = vmatpush3.bf16.msra.mxu1 %v835_v39 }
  0x48   : > { %386 = vmatmul.mubr.f32.vlgmr.msra.gmra.mrb[0].mxu0 %v1172_v60  ;;  %837 = vmatprep.subr.bf16.mxu1 %v859_v63 }
  0x4b   : > { %839 = vmatpush3.bf16.msra.mxu1 %v838_v42 }
 0x101   : > { %v665_v44 = vpop.f32.mrb[0].mxu1 }
 0x102   : > { %v666_v45 = vpop.f32.mrb[1].mxu1 }
 0x103   : > { %v667_v46 = vadd.f32 %v666_v45, %v665_v44 }
 0x11b   : > { %v387_v47 = vpop.f32.mrb[0].mxu0 }
 0x11c   : > { %v389_v48 = vpop.f32.mrb[1].mxu0 }
 0x11d   : > { %v462_v49 = vmul.f32 %v667_v46, %v389_v48 }
 0x11f   : > { %718 = vmatmul.mubr.f32.vlgmr.msra.gmra.mrb[2].mxu1 %v462_v49 }
 0x1f2   : > { %v545_v50 = vpop.f32.mrb[2].mxu1 }
 0x1f3   : > { %v549_v52 = vadd.f32 %v545_v50, %v387_v47  ;;  %v719_v53 = vpop.f32.mrb[3].mxu1 }
 0x1f5   : > { %v557_v55 = vmul.f32 %v628_v51, %v549_v52 }
 0x1f7   : > { %v565_v56 = vadd.f32 %v629_v54, %v557_v55 }
 0x1f9   : > { %566 = vst [vmem:[%s222_s28] sm:$0xff] %v565_v56 }
 0x1fa PF: > { %s15_s18 = sadd.s32 1, %s857_s18  }
 0x1fb   : > { %p12_p4 = scmp.ge.s32.totalorder %s15_s18, 6  }
 0x1fd   :  { %14 = sbr.rel (!%p12_p4) target bundleno = 1 (0x1), region = 70 }

// kernel: outer_product_forward.2
= control target key start
LH: loop header
LB: loop body
LE: loop exit
PB: predicated region body
PF: predicated region fallthrough
CT: control target
= control target key end

     0   :  { %s825_s12 = smov 0   ;;  %s1208_s0 = inlined_call_operand.vmem [shape: f32[32,256], index: 0, kind: input, shape index: {}]   ;;  %s1209_s1 = inlined_call_operand.vmem [shape: f32[256,384], index: 1, kind: input, shape index: {}]   ;;  %s1210_s2 = inlined_call_operand.vmem [shape: f32[128,128], index: 2, kind: input, shape index: {}]   ;;  %s1211_s3 = inlined_call_operand.vmem [shape: f32[4,2,128], index: 3, kind: output, shape index: {}]  }
   0x1 LB: > { %s565_s13 = sadd.s32 4294967295, %s800_s12   ;;  %p569_p0 = scmp.ge.s32.totalorder %s800_s12, 1  ;;  %s800_s12 = sphi %s825_s12, %s13_s12  }
   0x2   : > { %p137_p1 = scmp.lt.s32.totalorder %s800_s12, 5 }
   0x4   : > { %p138_p2 = pnand %p569_p0, %p137_p1 }
   0x5   : > { %v172_v0 = vld [vmem:[%s1209_s1 + $0x8] sm:$0xff] (!%p138_p2)  ;;  %v175_v1 = vld [vmem:[%s1209_s1 + $0x20] sm:$0xff] (!%p138_p2)  ;;  %v174_v4 = vld [vmem:[%s1209_s1 + $0x18] sm:$0xff] (!%p138_p2)  ;;  %p943_p3 = scmp.lt.s32.totalorder (!%p138_p2), %s565_s13, 3  ;;  %vm803_vm0 = vmmov (!%p138_p2), 0   ;;  %vm509_vm1 = vcmask (!%p138_p2), 1040384  }
   0x6   : > { %141 = sbr.rel (%p138_p2) target bundleno = 517 (0x205), region = 32  ;;  %v171_v2 = vld [vmem:[%s1209_s1] sm:$0xff] (!%p138_p2)  ;;  %v663_v3 = vpack.c.bf16 (!%p138_p2), %v175_v1, %v172_v0  ;;  %v178_v5 = vld [vmem:[%s1209_s1 + $0x38] sm:$0xff] (!%p138_p2)  ;;  %v181_v6 = vld [vmem:[%s1209_s1 + $0x50] sm:$0xff] (!%p138_p2) }
   0x7   : > { %v665_v7 = vpack.c.bf16 (!%p138_p2), %v174_v4, %v171_v2  ;;  %v667_v8 = vpack.c.bf16 (!%p138_p2), %v181_v6, %v178_v5  ;;  %v177_v9 = vld [vmem:[%s1209_s1 + $0x30] sm:$0xff] (!%p138_p2)  ;;  %v180_v10 = vld [vmem:[%s1209_s1 + $0x48] sm:$0xff] (!%p138_p2)  ;;  %v187_v12 = vld [vmem:[%s1209_s1 + $0x80] sm:$0xff] (!%p138_p2) }
   0x8   : > { %v184_v11 = vld [vmem:[%s1209_s1 + $0x68] sm:$0xff] (!%p138_p2)  ;;  %664 = vmatprep.subr.bf16.mxu0 (!%p138_p2), %v663_v3  ;;  %v669_v13 = vpack.c.bf16 (!%p138_p2), %v180_v10, %v177_v9  ;;  %v183_v15 = vld [vmem:[%s1209_s1 + $0x60] sm:$0xff] (!%p138_p2)  ;;  %v186_v16 = vld [vmem:[%s1209_s1 + $0x78] sm:$0xff] (!%p138_p2) }
   0x9   : > { %666 = vmatpush1.bf16.msra.mxu0 (!%p138_p2), %v665_v7  ;;  %v671_v14 = vpack.c.bf16 (!%p138_p2), %v187_v12, %v184_v11  ;;  %v190_v17 = vld [vmem:[%s1209_s1 + $0x98] sm:$0xff] (!%p138_p2)  ;;  %v193_v18 = vld [vmem:[%s1209_s1 + $0xb0] sm:$0xff] (!%p138_p2)  ;;  %v673_v19 = vpack.c.bf16 (!%p138_p2), %v186_v16, %v183_v15  ;;  %v192_v22 = vld [vmem:[%s1209_s1 + $0xa8] sm:$0xff] (!%p138_p2) }
   0xa   : > { %668 = vmatprep.subr.bf16.mxu0 (!%p138_p2), %v667_v8  ;;  %v675_v20 = vpack.c.bf16 (!%p138_p2), %v193_v18, %v190_v17  ;;  %v189_v21 = vld [vmem:[%s1209_s1 + $0x90] sm:$0xff] (!%p138_p2)  ;;  %v196_v23 = vld [vmem:[%s1209_s1 + $0xc8] sm:$0xff] (!%p138_p2)  ;;  %v199_v24 = vld [vmem:[%s1209_s1 + $0xe0] sm:$0xff] (!%p138_p2) }
   0xb   : > { %v221_v25 = vld [vmem:[%s1209_s1 + $0x190] sm:$0xff] (!%p138_p2)  ;;  %v224_v26 = vld [vmem:[%s1209_s1 + $0x1a8] sm:$0xff] (!%p138_p2)  ;;  %v677_v29 = vpack.c.bf16 (!%p138_p2), %v192_v22, %v189_v21  ;;  %v195_v30 = vld [vmem:[%s1209_s1 + $0xc0] sm:$0xff] (!%p138_p2)  ;;  %v679_v34 = vpack.c.bf16 (!%p138_p2), %v199_v24, %v196_v23 }
   0xc   : > { %v173_v27 = vld [vmem:[%s1209_s1 + $0x10] sm:$0xff] (!%p138_p2)  ;;  %v176_v28 = vld [vmem:[%s1209_s1 + $0x28] sm:$0xff] (!%p138_p2)  ;;  %v198_v31 = vld [vmem:[%s1209_s1 + $0xd8] sm:$0xff] (!%p138_p2)  ;;  %v727_v32 = vpack.c.bf16 (!%p138_p2), %v224_v26, %v221_v25 }
   0xd   : > { %670 = vmatpush1.bf16.msra.mxu0 %v669_v13  ;;  %v729_v33 = vpack.c.bf16 %v176_v28, %v173_v27  ;;  %v202_v35 = vld [vmem:[%s1209_s1 + $0xf8] sm:$0xff]  ;;  %v227_v36 = vld [vmem:[%s1209_s1 + $0x1c0] sm:$0xff]  ;;  %v205_v38 = vld [vmem:[%s1209_s1 + $0x110] sm:$0xff]  ;;  %v681_v43 = vpack.c.bf16 %v198_v31, %v195_v30  ;;  %s1214_s13 = smov (!%p943_p3, %s565_s13), 3 }
   0xe   : > { %672 = vmatprep.subr.bf16.mxu0 %v671_v14  ;;  %v230_v37 = vld [vmem:[%s1209_s1 + $0x1d8] sm:$0xff]  ;;  %728 = vmatprep.subr.bf16.mxu1 %v727_v32  ;;  %v179_v40 = vld [vmem:[%s1209_s1 + $0x40] sm:$0xff]  ;;  %v233_v44 = vld [vmem:[%s1209_s1 + $0x1f0] sm:$0xff]  ;;  %v683_v47 = vpack.c.bf16 %v205_v38, %v202_v35  ;;  %s575_s23 = sshll.u32 %s1214_s13, 4 }
   0xf   : > { %v731_v39 = vpack.c.bf16 %v230_v37, %v227_v36  ;;  %v182_v41 = vld [vmem:[%s1209_s1 + $0x58] sm:$0xff]  ;;  %730 = vmatpush3.bf16.msra.mxu1 %v729_v33  ;;  %v236_v45 = vld [vmem:[%s1209_s1 + $0x208] sm:$0xff]  ;;  %v185_v46 = vld [vmem:[%s1209_s1 + $0x70] sm:$0xff]  ;;  %s1026_s10 = scalar_lea.vmem %s1208_s0, %s575_s23 }
  0x10   : > { %v733_v42 = vpack.c.bf16 %v182_v41, %v179_v40  ;;  %v201_v48 = vld [vmem:[%s1209_s1 + $0xf0] sm:$0xff]  ;;  %v204_v49 = vld [vmem:[%s1209_s1 + $0x108] sm:$0xff]  ;;  %v735_v50 = vpack.c.bf16 %v236_v45, %v233_v44  ;;  %v211_v53 = vld [vmem:[%s1209_s1 + $0x140] sm:$0xff] }
  0x11   : > { %674 = vmatpush1.bf16.msra.mxu0 %v673_v19  ;;  %732 = vmatprep.subr.bf16.mxu1 %v731_v39  ;;  %v188_v51 = vld [vmem:[%s1209_s1 + $0x88] sm:$0xff]  ;;  %v239_v54 = vld [vmem:[%s1209_s1 + $0x220] sm:$0xff]  ;;  %v242_v56 = vld [vmem:[%s1209_s1 + $0x238] sm:$0xff]  ;;  %v685_v57 = vpack.c.bf16 %v204_v49, %v201_v48 }
  0x12   : > { %676 = vmatprep.subr.bf16.mxu0 %v675_v20  ;;  %v208_v52 = vld [vmem:[%s1209_s1 + $0x128] sm:$0xff]  ;;  %v737_v55 = vpack.c.bf16 %v188_v51, %v185_v46  ;;  %v207_v58 = vld [vmem:[%s1209_s1 + $0x120] sm:$0xff]  ;;  %v739_v59 = vpack.c.bf16 %v242_v56, %v239_v54  ;;  %v194_v61 = vld [vmem:[%s1209_s1 + $0xb8] sm:$0xff] }
  0x13   : > { %734 = vmatpush3.bf16.msra.mxu1 %v733_v42  ;;  %v191_v60 = vld [vmem:[%s1209_s1 + $0xa0] sm:$0xff]  ;;  %v687_v62 = vpack.c.bf16 %v211_v53, %v208_v52  ;;  %v210_v63 = vld [vmem:[%s1209_s1 + $0x138] sm:$0xff]  ;;  %v245_v0 = vld [vmem:[%s1209_s1 + $0x250] sm:$0xff] }
  0x14   : > { %736 = vmatprep.subr.bf16.mxu1 %v735_v50  ;;  %v248_v1 = vld [vmem:[%s1209_s1 + $0x268] sm:$0xff]  ;;  %v214_v2 = vld [vmem:[%s1209_s1 + $0x158] sm:$0xff]  ;;  %v217_v3 = vld [vmem:[%s1209_s1 + $0x170] sm:$0xff]  ;;  %v741_v4 = vpack.c.bf16 %v194_v61, %v191_v60  ;;  %v689_v5 = vpack.c.bf16 %v210_v63, %v207_v58  ;;  %v802_v63 = vmov 0.0|0.0  }
  0x15   : > { %678 = vmatpush1.bf16.msra.mxu0 %v677_v29  ;;  %v213_v6 = vld [vmem:[%s1209_s1 + $0x150] sm:$0xff]  ;;  %v743_v7 = vpack.c.bf16 %v248_v1, %v245_v0  ;;  %v200_v9 = vld [vmem:[%s1209_s1 + $0xe8] sm:$0xff]  ;;  %v691_v10 = vpack.c.bf16 %v217_v3, %v214_v2  ;;  %v251_v12 = vld [vmem:[%s1209_s1 + $0x280] sm:$0xff] }
  0x16   : > { %680 = vmatprep.subr.bf16.mxu0 %v679_v34  ;;  %v197_v8 = vld [vmem:[%s1209_s1 + $0xd0] sm:$0xff]  ;;  %v216_v11 = vld [vmem:[%s1209_s1 + $0x168] sm:$0xff]  ;;  %v254_v13 = vld [vmem:[%s1209_s1 + $0x298] sm:$0xff] }
  0x17   : > { %738 = vmatpush3.bf16.msra.mxu1 %v737_v55  ;;  %v220_v14 = vld [vmem:[%s1209_s1 + $0x188] sm:$0xff]  ;;  %v223_v15 = vld [vmem:[%s1209_s1 + $0x1a0] sm:$0xff]  ;;  %v745_v16 = vpack.c.bf16 %v200_v9, %v197_v8  ;;  %v693_v17 = vpack.c.bf16 %v216_v11, %v213_v6  ;;  %v747_v19 = vpack.c.bf16 %v254_v13, %v251_v12  ;;  %v206_v21 = vld [vmem:[%s1209_s1 + $0x118] sm:$0xff] }
  0x18   : > { %740 = vmatprep.subr.bf16.mxu1 %v739_v59  ;;  %v219_v18 = vld [vmem:[%s1209_s1 + $0x180] sm:$0xff]  ;;  %v695_v22 = vpack.c.bf16 %v223_v15, %v220_v14  ;;  %v222_v23 = vld [vmem:[%s1209_s1 + $0x198] sm:$0xff]  ;;  %v257_v24 = vld [vmem:[%s1209_s1 + $0x2b0] sm:$0xff] }
  0x19   : > { %682 = vmatpush1.bf16.msra.mxu0 %v681_v43  ;;  %v203_v20 = vld [vmem:[%s1209_s1 + $0x100] sm:$0xff]  ;;  %v260_v25 = vld [vmem:[%s1209_s1 + $0x2c8] sm:$0xff]  ;;  %v226_v26 = vld [vmem:[%s1209_s1 + $0x1b8] sm:$0xff]  ;;  %v697_v30 = vpack.c.bf16 %v222_v23, %v219_v18 }
  0x1a   : > { %684 = vmatprep.subr.bf16.mxu0 %v683_v47  ;;  %v229_v27 = vld [vmem:[%s1209_s1 + $0x1d0] sm:$0xff]  ;;  %v749_v28 = vpack.c.bf16 %v206_v21, %v203_v20  ;;  %v170_v29 = vld [vmem:[%s1026_s10 + $0x8] sm:$0xff]  ;;  %v751_v32 = vpack.c.bf16 %v260_v25, %v257_v24  ;;  %v263_v37 = vld [vmem:[%s1209_s1 + $0x2e0] sm:$0xff] }
  0x1b   : > { %742 = vmatpush3.bf16.msra.mxu1 %v741_v4  ;;  %v225_v31 = vld [vmem:[%s1209_s1 + $0x1b0] sm:$0xff]  ;;  %v212_v34 = vld [vmem:[%s1209_s1 + $0x148] sm:$0xff]  ;;  %v699_v35 = vpack.c.bf16 %v229_v27, %v226_v26  ;;  %v266_v38 = vld [vmem:[%s1209_s1 + $0x2f8] sm:$0xff]  ;;  %402 = vmatprep.mubr.f32.mxu1 %v170_v29 }
  0x1c   : > { %744 = vmatprep.subr.bf16.mxu1 %v743_v7  ;;  %v209_v33 = vld [vmem:[%s1209_s1 + $0x130] sm:$0xff]  ;;  %v228_v36 = vld [vmem:[%s1209_s1 + $0x1c8] sm:$0xff]  ;;  %v235_v40 = vld [vmem:[%s1209_s1 + $0x200] sm:$0xff]  ;;  %331 = vmatprep.mubr.f32.mxu0 %v170_v29  ;;  %v755_v43 = vpack.c.bf16 %v266_v38, %v263_v37 }
  0x1d   : > { %686 = vmatpush1.bf16.msra.mxu0 %v685_v57  ;;  %v232_v39 = vld [vmem:[%s1209_s1 + $0x1e8] sm:$0xff]  ;;  %v753_v41 = vpack.c.bf16 %v212_v34, %v209_v33  ;;  %v701_v42 = vpack.c.bf16 %v228_v36, %v225_v31  ;;  %v215_v44 = vld [vmem:[%s1209_s1 + $0x160] sm:$0xff]  ;;  %v218_v45 = vld [vmem:[%s1209_s1 + $0x178] sm:$0xff] }
  0x1e   : > { %688 = vmatprep.subr.bf16.mxu0 %v687_v62  ;;  %v703_v46 = vpack.c.bf16 %v235_v40, %v232_v39  ;;  %v231_v47 = vld [vmem:[%s1209_s1 + $0x1e0] sm:$0xff]  ;;  %v234_v48 = vld [vmem:[%s1209_s1 + $0x1f8] sm:$0xff]  ;;  %v241_v50 = vld [vmem:[%s1209_s1 + $0x230] sm:$0xff]  ;;  %v757_v51 = vpack.c.bf16 %v218_v45, %v215_v44 }
  0x1f   : > { %746 = vmatpush3.bf16.msra.mxu1 %v745_v16  ;;  %v238_v49 = vld [vmem:[%s1209_s1 + $0x218] sm:$0xff]  ;;  %v705_v52 = vpack.c.bf16 %v234_v48, %v231_v47  ;;  %v409_v53 = vld [vmem:[%s1210_s2] sm:$0xff]  ;;  %v410_v54 = vld [vmem:[%s1210_s2 + $0x8] sm:$0xff] }
  0x20   : > { %748 = vmatprep.subr.bf16.mxu1 %v747_v19  ;;  %v707_v55 = vpack.c.bf16 %v241_v50, %v238_v49  ;;  %v237_v56 = vld [vmem:[%s1209_s1 + $0x210] sm:$0xff]  ;;  %v240_v57 = vld [vmem:[%s1209_s1 + $0x228] sm:$0xff]  ;;  %v247_v59 = vld [vmem:[%s1209_s1 + $0x260] sm:$0xff]  ;;  %v760_v61 = vpack.c.bf16 %v410_v54, %v409_v53 }
  0x21   : > { %690 = vmatpush1.bf16.msra.mxu0 %v689_v5  ;;  %v244_v58 = vld [vmem:[%s1209_s1 + $0x248] sm:$0xff]  ;;  %v1105_v60 = vld [vmem:[%s1026_s10] sm:$0xff]  ;;  %v709_v62 = vpack.c.bf16 %v240_v57, %v237_v56  ;;  %v411_v0 = vld [vmem:[%s1210_s2 + $0x10] sm:$0xff]  ;;  %s572_s10 = sshll.u32 %s1214_s13, 1 }
  0x22   : > { %692 = vmatprep.subr.bf16.mxu0 %v691_v10  ;;  %v412_v1 = vld [vmem:[%s1210_s2 + $0x18] sm:$0xff]  ;;  %v711_v2 = vpack.c.bf16 %v247_v59, %v244_v58  ;;  %v243_v3 = vld [vmem:[%s1209_s1 + $0x240] sm:$0xff]  ;;  %v253_v6 = vld [vmem:[%s1209_s1 + $0x290] sm:$0xff]  ;;  %s168_s22 = scalar_lea.vmem %s1211_s3, %s572_s10 }
  0x23   : > { %750 = vmatpush3.bf16.msra.mxu1 %v749_v28  ;;  %v246_v4 = vld [vmem:[%s1209_s1 + $0x258] sm:$0xff]  ;;  %v763_v7 = vpack.c.bf16 %v412_v1, %v411_v0  ;;  %v413_v9 = vld [vmem:[%s1210_s2 + $0x20] sm:$0xff]  ;;  %v414_v10 = vld [vmem:[%s1210_s2 + $0x28] sm:$0xff] }
  0x24   : > { %752 = vmatprep.subr.bf16.mxu1 %v751_v32  ;;  %v250_v5 = vld [vmem:[%s1209_s1 + $0x278] sm:$0xff]  ;;  %v713_v8 = vpack.c.bf16 %v246_v4, %v243_v3  ;;  %v249_v12 = vld [vmem:[%s1209_s1 + $0x270] sm:$0xff]  ;;  %v252_v13 = vld [vmem:[%s1209_s1 + $0x288] sm:$0xff]  ;;  %v766_v16 = vpack.c.bf16 %v414_v10, %v413_v9 }
  0x25   : > { %694 = vmatpush1.bf16.msra.mxu0 %v693_v17  ;;  %v715_v11 = vpack.c.bf16 %v253_v6, %v250_v5  ;;  %v256_v14 = vld [vmem:[%s1209_s1 + $0x2a8] sm:$0xff]  ;;  %v259_v15 = vld [vmem:[%s1209_s1 + $0x2c0] sm:$0xff]  ;;  %v717_v17 = vpack.c.bf16 %v252_v13, %v249_v12  ;;  %v415_v18 = vld [vmem:[%s1210_s2 + $0x30] sm:$0xff] }
  0x26   : > { %696 = vmatprep.subr.bf16.mxu0 %v695_v22  ;;  %v416_v19 = vld [vmem:[%s1210_s2 + $0x38] sm:$0xff]  ;;  %v719_v20 = vpack.c.bf16 %v259_v15, %v256_v14  ;;  %v255_v21 = vld [vmem:[%s1209_s1 + $0x2a0] sm:$0xff]  ;;  %v265_v24 = vld [vmem:[%s1209_s1 + $0x2f0] sm:$0xff] }
  0x27   : > { %754 = vmatpush3.bf16.msra.mxu1 %v753_v41  ;;  %v258_v22 = vld [vmem:[%s1209_s1 + $0x2b8] sm:$0xff]  ;;  %v769_v25 = vpack.c.bf16 %v416_v19, %v415_v18  ;;  %v417_v27 = vld [vmem:[%s1210_s2 + $0x40] sm:$0xff]  ;;  %v418_v28 = vld [vmem:[%s1210_s2 + $0x48] sm:$0xff] }
  0x28   : > { %756 = vmatprep.subr.bf16.mxu1 %v755_v43  ;;  %v262_v23 = vld [vmem:[%s1209_s1 + $0x2d8] sm:$0xff]  ;;  %v721_v26 = vpack.c.bf16 %v258_v22, %v255_v21  ;;  %v264_v31 = vld [vmem:[%s1209_s1 + $0x2e8] sm:$0xff]  ;;  %v772_v32 = vpack.c.bf16 %v418_v28, %v417_v27  ;;  %v419_v34 = vld [vmem:[%s1210_s2 + $0x50] sm:$0xff]  ;;  %v804_v43 = vmov 0.0  }
  0x29   : > { %698 = vmatpush1.bf16.msra.mxu0 %v697_v30  ;;  %v723_v29 = vpack.c.bf16 %v265_v24, %v262_v23  ;;  %v261_v30 = vld [vmem:[%s1209_s1 + $0x2d0] sm:$0xff]  ;;  %v421_v37 = vld [vmem:[%s1210_s2 + $0x60] sm:$0xff]  ;;  %v422_v38 = vld [vmem:[%s1210_s2 + $0x68] sm:$0xff] }
  0x2a   : > { %700 = vmatprep.subr.bf16.mxu0 %v699_v35  ;;  %v725_v33 = vpack.c.bf16 %v264_v31, %v261_v30  ;;  %v420_v35 = vld [vmem:[%s1210_s2 + $0x58] sm:$0xff]  ;;  %v778_v39 = vpack.c.bf16 %v422_v38, %v421_v37  ;;  %v423_v40 = vld [vmem:[%s1210_s2 + $0x70] sm:$0xff] }
  0x2b   : > { %758 = vmatpush3.bf16.msra.mxu1 %v757_v51  ;;  %v775_v36 = vpack.c.bf16 %v420_v35, %v419_v34  ;;  %v424_v41 = vld [vmem:[%s1210_s2 + $0x78] sm:$0xff] }
  0x2c   : > { %759 = vmatprep.subr.bf16.mxu1 %v802_v63 }
  0x2d   : > { %702 = vmatpush1.bf16.msra.mxu0 %v701_v42  ;;  %v781_v42 = vpack.c.bf16 %v424_v41, %v423_v40 }
  0x2e   : > { %704 = vmatprep.subr.bf16.mxu0 %v703_v46  ;;  %403 = vmatmul.mubr.f32.vlgmr.msra.gmra.mrb[0].mxu1 %v1105_v60 }
  0x2f   : > { %761 = vmatpush3.bf16.msra.mxu1 %v760_v61  ;;  %660 = vmatprep.mubr.msk.f32.mxu1 %vm803_vm0, %v804_v43 }
  0x30   : > { %762 = vmatprep.subr.bf16.mxu1 %v802_v63 }
  0x31   : > { %706 = vmatpush1.bf16.msra.mxu0 %v705_v52 }
  0x32   : > { %708 = vmatprep.subr.bf16.mxu0 %v707_v55 }
  0x33   : > { %764 = vmatpush3.bf16.msra.mxu1 %v763_v7 }
  0x34   : > { %765 = vmatprep.subr.bf16.mxu1 %v802_v63 }
  0x35   : > { %710 = vmatpush1.bf16.msra.mxu0 %v709_v62 }
  0x36   : > { %712 = vmatprep.subr.bf16.mxu0 %v711_v2 }
  0x37   : > { %767 = vmatpush3.bf16.msra.mxu1 %v766_v16 }
  0x38   : > { %768 = vmatprep.subr.bf16.mxu1 %v802_v63 }
  0x39   : > { %714 = vmatpush1.bf16.msra.mxu0 %v713_v8 }
  0x3a   : > { %716 = vmatprep.subr.bf16.mxu0 %v715_v11 }
  0x3b   : > { %770 = vmatpush3.bf16.msra.mxu1 %v769_v25 }
  0x3c   : > { %771 = vmatprep.subr.bf16.mxu1 %v802_v63 }
  0x3d   : > { %718 = vmatpush1.bf16.msra.mxu0 %v717_v17 }
  0x3e   : > { %720 = vmatprep.subr.bf16.mxu0 %v719_v20 }
  0x3f   : > { %773 = vmatpush3.bf16.msra.mxu1 %v772_v32 }
  0x40   : > { %774 = vmatprep.subr.bf16.mxu1 %v802_v63 }
  0x41   : > { %722 = vmatpush1.bf16.msra.mxu0 %v721_v26 }
  0x42   : > { %724 = vmatprep.subr.bf16.mxu0 %v723_v29 }
  0x43   : > { %776 = vmatpush3.bf16.msra.mxu1 %v775_v36 }
  0x44   : > { %777 = vmatprep.subr.bf16.mxu1 %v802_v63 }
  0x45   : > { %726 = vmatpush1.bf16.msra.mxu0 %v725_v33 }
  0x47   : > { %779 = vmatpush3.bf16.msra.mxu1 %v778_v39 }
  0x48   : > { %332 = vmatmul.mubr.f32.vlgmr.msra.gmra.mrb[0].mxu0 %v1105_v60  ;;  %780 = vmatprep.subr.bf16.mxu1 %v802_v63 }
  0x4b   : > { %782 = vmatpush3.bf16.msra.mxu1 %v781_v42 }
 0x101   : > { %v608_v44 = vpop.f32.mrb[0].mxu1 }
 0x102   : > { %v609_v45 = vpop.f32.mrb[1].mxu1 }
 0x103   : > { %v610_v46 = vadd.f32 %v609_v45, %v608_v44 }
 0x11b   : > { %v333_v47 = vpop.f32.mrb[0].mxu0 }
 0x11c   : > { %v335_v48 = vpop.f32.mrb[1].mxu0 }
 0x11d   : > { %v408_v49 = vmul.f32 %v610_v46, %v335_v48 }
 0x11f   : > { %661 = vmatmul.mubr.f32.vlgmr.msra.gmra.mrb[2].mxu1 %v408_v49 }
 0x1f2   : > { %v491_v50 = vpop.f32.mrb[2].mxu1 }
 0x1f3   : > { %v495_v51 = vadd.f32 %v491_v50, %v333_v47  ;;  %v662_v52 = vpop.f32.mrb[3].mxu1 }
 0x1f5   : > { %v496_v53 = vrot.slane %v495_v51, 4  ;;  %v502_v54 = vmul.f32 %v495_v51, %v495_v51 }
 0x1f7   : > { %v497_v55 = vadd.f32 %v496_v53, %v495_v51  ;;  %v503_v56 = vrot.slane %v502_v54, 4 }
 0x1f9   : > { %v498_v57 = vrot.slane %v497_v55, 2  ;;  %v504_v58 = vadd.f32 %v503_v56, %v502_v54 }
 0x1fb   : > { %v499_v59 = vadd.f32 %v498_v57, %v497_v55  ;;  %v505_v60 = vrot.slane %v504_v58, 2 }
 0x1fd   : > { %v500_v61 = vrot.slane %v499_v59, 1  ;;  %v506_v62 = vadd.f32 %v505_v60, %v504_v58 }
 0x1ff   : > { %v507_v63 = vrot.slane %v506_v62, 1  ;;  %v501_v0 = vadd.f32 %v500_v61, %v499_v59 }
 0x201   : > { %v508_v1 = vadd.f32 %v507_v63, %v506_v62 }
 0x203   : > { %v510_v2 = vsel %vm509_vm1, %v501_v0, %v508_v1 }
 0x204   : > { %511 = vst [vmem:[%s168_s22] sm:$0x3] %v510_v2 }
 0x205 PF: > { %s13_s12 = sadd.s32 1, %s800_s12  }
 0x206   : > { %p10_p4 = scmp.ge.s32.totalorder %s13_s12, 6  }
 0x208   :  { %12 = sbr.rel (!%p10_p4) target bundleno = 1 (0x1), region = 62 }

</bundles_post_ra>
